<compile_context>
chip_gen: v7x
topology: tpu7x:2x2x1
jax: 0.10.0
libtpu: 0.0.40
codegen_flags: <defaults>
</compile_context>

<pallas_src>
import jax
import jax.numpy as jnp
from jax.experimental import pallas as pl
from jax.experimental.pallas import tpu as pltpu


def _test_model_kernel(patches_ref, wconv_ref, wfc_ref, bfc_ref, out_ref):
    # patches_ref: (K+1, B*HW)   lane-dense, last row is all-ones (bias fold)
    # wconv_ref:   (C_out, K+1)  conv weight rows + bias column
    # wfc_ref:     (C_out, n_classes)  already scaled by 1/HW
    # bfc_ref:     (n_classes, 1)
    # out_ref:     (n_classes, B)      softmax probabilities, transposed
    n_classes, batch = out_ref.shape
    _, n_cols = patches_ref.shape
    hw = n_cols // batch

    # Conv (+bias) as a single flat MXU matmul, lane-dense (C_out, B*HW) output.
    feats = jnp.dot(wconv_ref[...], patches_ref[...],
                    preferred_element_type=jnp.float32)          # (C_out, B*HW)
    feats = jnp.maximum(feats, 0.0)                               # ReLU (VPU)

    # Global average pool: lane-axis reduce per batch (slices are vreg-aligned,
    # HW = 256 = 2*128 lanes).  The 1/HW scale is folded into wfc in the wrapper.
    pooled = jnp.concatenate(
        [jnp.sum(feats[:, b * hw:(b + 1) * hw], axis=-1, keepdims=True)
         for b in range(batch)],
        axis=-1)                                                  # (C_out, B)

    # Classifier head on VPU/XLU: logitsT[j, b] = sum_c pooled[c, b]*wfc[c, j].
    wfc = wfc_ref[...]
    logits_t = jnp.concatenate(
        [jnp.sum(pooled * wfc[:, j:j + 1], axis=0, keepdims=True)
         for j in range(n_classes)],
        axis=0)                                                   # (n_classes, B)
    logits_t = logits_t + bfc_ref[...]

    # Softmax over the class dimension (axis 0 of the transposed logits).
    m = jnp.max(logits_t, axis=0, keepdims=True)
    e = jnp.exp(logits_t - m)
    out_ref[...] = e / jnp.sum(e, axis=0, keepdims=True)


def test_model_forward(x, params):
    """x: f32[B, C_in, H, W] (NCHW). Returns softmax probabilities f32[B, 2]."""
    wconv, bconv, wfc, bfc = params
    B, C_in, H, W = x.shape
    C_out = wconv.shape[0]
    n_classes = wfc.shape[1]
    HW = H * W

    # --- glue: im2col for 3x3/stride1/pad1 conv, emitted directly in the
    # lane-dense (K, B*HW) orientation the kernel consumes. -----------------
    xp = jnp.pad(x, ((0, 0), (0, 0), (1, 1), (1, 1)))
    taps = [xp[:, :, dy:dy + H, dx:dx + W]               # each (B, C_in, H, W)
            for dy in range(3) for dx in range(3)]
    patches = jnp.stack(taps, axis=0)                     # (9, B, C_in, H, W)
    patches = patches.transpose(2, 0, 1, 3, 4).reshape(C_in * 9, B * HW)
    # Append a constant-ones row so the conv bias rides the same matmul.
    patches = jnp.concatenate(
        [patches, jnp.ones((1, B * HW), jnp.float32)], axis=0)   # (K+1, B*HW)

    # Weight (C_out, C_in, 3, 3) -> (C_out, C_in*9) rows (matching tap order),
    # with the bias appended as the last column.
    wconv_mat = jnp.concatenate(
        [wconv.reshape(C_out, C_in * 9), bconv.reshape(C_out, 1)], axis=1)

    # Fold the global-average-pool 1/HW scale into the FC weight (pool is
    # linear and applied after ReLU, before the FC, so this is exact).
    wfc_scaled = wfc / HW                                  # (C_out, n_classes)
    bfc_col = bfc.reshape(n_classes, 1)

    vm = pl.BlockSpec(memory_space=pltpu.MemorySpace.VMEM)
    probs_t = pl.pallas_call(
        _test_model_kernel,
        out_shape=jax.ShapeDtypeStruct((n_classes, B), jnp.float32),
        in_specs=[vm, vm, vm, vm],
        out_specs=vm,
    )(patches, wconv_mat, wfc_scaled, bfc_col)
    return probs_t.T                                       # (B, n_classes)


def _reference(x, params):
    wconv, bconv, wfc, bfc = params
    y = jax.lax.conv_general_dilated(
        x, wconv, window_strides=(1, 1), padding="SAME",
        dimension_numbers=("NCHW", "OIHW", "NCHW"))
    y = jnp.maximum(y + bconv[None, :, None, None], 0.0)
    pooled = jnp.mean(y, axis=(2, 3))
    logits = pooled @ wfc + bfc
    return jax.nn.softmax(logits, axis=-1)


if __name__ == "__main__":
    B, C_in, H, W = 2, 3, 16, 16
    C_out, n_classes = 8, 2

    key = jax.random.PRNGKey(0)
    kx, kwc, kbc, kwf, kbf = jax.random.split(key, 5)

    x = jax.random.normal(kx, (B, C_in, H, W), dtype=jnp.float32)
    wconv = 0.1 * jax.random.normal(kwc, (C_out, C_in, 3, 3), dtype=jnp.float32)
    bconv = 0.1 * jax.random.normal(kbc, (C_out,), dtype=jnp.float32)
    wfc = 0.1 * jax.random.normal(kwf, (C_out, n_classes), dtype=jnp.float32)
    bfc = 0.1 * jax.random.normal(kbf, (n_classes,), dtype=jnp.float32)
    params = (wconv, bconv, wfc, bfc)

    out = test_model_forward(x, params)
    out = jax.block_until_ready(out)

    ref = jax.block_until_ready(_reference(x, params))
    assert out.shape == (B, n_classes)
    assert jnp.allclose(out, ref, atol=1e-5, rtol=1e-5), (out, ref)
    assert jnp.allclose(jnp.sum(out, axis=-1), 1.0, atol=1e-5)

    print("KERNEL_OK")
</pallas_src>

<mosaic_0001>
module attributes {stable_mosaic.version = 11 : i64} {
  func.func @_test_model_kernel(%arg0: memref<28x512xf32, #tpu.memory_space<vmem>>, %arg1: memref<8x28xf32, #tpu.memory_space<vmem>>, %arg2: memref<8x2xf32, #tpu.memory_space<vmem>>, %arg3: memref<2x1xf32, #tpu.memory_space<vmem>>, %arg4: memref<2x2xf32, #tpu.memory_space<vmem>>) attributes {dimension_semantics = [], scalar_prefetch = 0 : i64, scratch_operands = 0 : i64, tpu.core_type = #tpu.core_type<tc>} {
    %c0 = arith.constant 0 : index
    %c0_0 = arith.constant 0 : index
    %0 = vector.load %arg1[%c0, %c0_0] : memref<8x28xf32, #tpu.memory_space<vmem>>, vector<8x28xf32>
    %c0_1 = arith.constant 0 : index
    %c0_2 = arith.constant 0 : index
    %1 = vector.load %arg0[%c0_1, %c0_2] : memref<28x512xf32, #tpu.memory_space<vmem>>, vector<28x512xf32>
    %cst = arith.constant dense<0.000000e+00> : vector<8x512xf32>
    %2 = tpu.matmul %0, %1, %cst {dimension_numbers = #tpu.dot_dimension_numbers<[1], [0], [0], [1], [0, 0, 1, 1], [], []>} : vector<8x28xf32>, vector<28x512xf32>, vector<8x512xf32> -> vector<8x512xf32>
    %cst_3 = arith.constant 0.000000e+00 : f32
    %3 = vector.broadcast %cst_3 : f32 to vector<8x512xf32>
    %4 = arith.maximumf %2, %3 : vector<8x512xf32>
    %5 = vector.extract_strided_slice %4 {offsets = [0, 0], sizes = [8, 256], strides = [1, 1]} : vector<8x512xf32> to vector<8x256xf32>
    %cst_4 = arith.constant dense<0.000000e+00> : vector<8xf32>
    %6 = vector.multi_reduction <add>, %5, %cst_4 [1] : vector<8x256xf32> to vector<8xf32>
    %7 = vector.shape_cast %6 : vector<8xf32> to vector<8x1xf32>
    %8 = vector.extract_strided_slice %4 {offsets = [0, 256], sizes = [8, 256], strides = [1, 1]} : vector<8x512xf32> to vector<8x256xf32>
    %cst_5 = arith.constant dense<0.000000e+00> : vector<8xf32>
    %9 = vector.multi_reduction <add>, %8, %cst_5 [1] : vector<8x256xf32> to vector<8xf32>
    %10 = vector.shape_cast %9 : vector<8xf32> to vector<8x1xf32>
    %11 = tpu.concatenate %7, %10 in 1 : vector<8x1xf32>, vector<8x1xf32> -> vector<8x2xf32>
    %c0_6 = arith.constant 0 : index
    %c0_7 = arith.constant 0 : index
    %12 = vector.load %arg2[%c0_6, %c0_7] : memref<8x2xf32, #tpu.memory_space<vmem>>, vector<8x2xf32>
    %13 = vector.extract_strided_slice %12 {offsets = [0, 0], sizes = [8, 1], strides = [1, 1]} : vector<8x2xf32> to vector<8x1xf32>
    %14 = vector.broadcast %13 : vector<8x1xf32> to vector<8x2xf32>
    %15 = arith.mulf %11, %14 : vector<8x2xf32>
    %cst_8 = arith.constant dense<0.000000e+00> : vector<2xf32>
    %16 = vector.multi_reduction <add>, %15, %cst_8 [0] : vector<8x2xf32> to vector<2xf32>
    %17 = vector.shape_cast %16 : vector<2xf32> to vector<1x2xf32>
    %18 = vector.extract_strided_slice %12 {offsets = [0, 1], sizes = [8, 1], strides = [1, 1]} : vector<8x2xf32> to vector<8x1xf32>
    %19 = vector.broadcast %18 : vector<8x1xf32> to vector<8x2xf32>
    %20 = arith.mulf %11, %19 : vector<8x2xf32>
    %cst_9 = arith.constant dense<0.000000e+00> : vector<2xf32>
    %21 = vector.multi_reduction <add>, %20, %cst_9 [0] : vector<8x2xf32> to vector<2xf32>
    %22 = vector.shape_cast %21 : vector<2xf32> to vector<1x2xf32>
    %23 = tpu.concatenate %17, %22 in 0 : vector<1x2xf32>, vector<1x2xf32> -> vector<2x2xf32>
    %c0_10 = arith.constant 0 : index
    %c0_11 = arith.constant 0 : index
    %24 = vector.load %arg3[%c0_10, %c0_11] : memref<2x1xf32, #tpu.memory_space<vmem>>, vector<2x1xf32>
    %25 = vector.broadcast %24 : vector<2x1xf32> to vector<2x2xf32>
    %26 = arith.addf %23, %25 : vector<2x2xf32>
    %cst_12 = arith.constant dense<0xFF800000> : vector<2xf32>
    %27 = vector.multi_reduction <maximumf>, %26, %cst_12 [0] : vector<2x2xf32> to vector<2xf32>
    %28 = vector.shape_cast %27 : vector<2xf32> to vector<1x2xf32>
    %29 = vector.broadcast %28 : vector<1x2xf32> to vector<2x2xf32>
    %30 = arith.subf %26, %29 : vector<2x2xf32>
    %31 = math.exp %30 : vector<2x2xf32>
    %cst_13 = arith.constant dense<0.000000e+00> : vector<2xf32>
    %32 = vector.multi_reduction <add>, %31, %cst_13 [0] : vector<2x2xf32> to vector<2xf32>
    %33 = vector.shape_cast %32 : vector<2xf32> to vector<1x2xf32>
    %34 = vector.broadcast %33 : vector<1x2xf32> to vector<2x2xf32>
    %35 = arith.divf %31, %34 : vector<2x2xf32>
    %c0_14 = arith.constant 0 : index
    %c0_15 = arith.constant 0 : index
    %36 = vector.load %arg4[%c0_14, %c0_15] : memref<2x2xf32, #tpu.memory_space<vmem>>, vector<2x2xf32>
    tpu.vector_store %arg4[%c0_14, %c0_15], %35 {strides = array<i32>} : memref<2x2xf32, #tpu.memory_space<vmem>>, vector<2x2xf32>,
    return
  }
}

</mosaic_0001>

<bundles_post_ra>
// kernel: tpu_custom_call.1
= control target key start
LH: loop header
LB: loop body
LE: loop exit
PB: predicated region body
PF: predicated region fallthrough
CT: control target
= control target key end

     0   :  { %9 = vsyncpa [#allocation3], 0  ;;  %s462_s0 = inlined_call_operand.hbm [shape: f32[28,512], index: 0, kind: input, shape index: {}]   ;;  %s463_s1 = inlined_call_operand.vmem [shape: f32[8,28], index: 1, kind: input, shape index: {}]   ;;  %s464_s2 = inlined_call_operand.vmem [shape: f32[8,2], index: 2, kind: input, shape index: {}]   ;;  %s465_s3 = inlined_call_operand.vmem [shape: f32[2,1], index: 3, kind: input, shape index: {}]   ;;  %s466_s4 = inlined_call_operand.hbm [shape: f32[2,2], index: 4, kind: output, shape index: {}]  }
   0x1   :  { %10 = vsyncpa [#allocation4], 0  ;;  %s381_s15 = smov [#allocation2]   ;;  %s333_s19 = scalar_lea.hbm %s462_s0, 2048 }
   0x2   :  { %s16_s16 = sshll.u32 %s381_s15, 4  ;;  %p334_p0 = scmp.ne.s32.totalorder %s462_s0, %s333_s19  ;;  %s17_s16 = int_to_ptr.vmem [resolvable:$true] %s16_s16 }
   0x3   :  { %p337_p1 = scmp.lt.u32.totalorder %s333_s19, %s462_s0 }
   0x5   :  { %p339_p2 = pnand %p337_p1, %p334_p0 }
   0x7   :  { %342 = shalt.err (!%p339_p2)
}
   0x8   :  { %s343_s24 = scalar_lea.vmem %s17_s16, 2048  ;;  %p348_p4 = scmp.lt.s32.totalorder %s17_s16, %s17_s16 }
   0x9   :  { %p344_p3 = scmp.ne.s32.totalorder %s17_s16, %s343_s24  ;;  %p349_p5 = scmp.lt.s32.totalorder %s343_s24, %s343_s24 }
   0xb   :  { %p350_p6 = por %p349_p5, %p348_p4 }
   0xd   :  { %p351_p7 = pnand %p350_p6, %p344_p3 }
   0xf   :  { %354 = shalt.err (!%p351_p7)
}
  0x10   :  { %s382_s25 = smov 512   ;;  %s383_s26 = smov 32  }
  0x11   :  { %22 = dma.hbm_to_vmem [thread:$0]  %s462_s0, 2048, %s17_s16, [#allocation3], %s382_s25, %s382_s25, %s383_s26  }
  0x12   :  { %377 = dma.done.wait [#allocation3], 2048  }
  0x13   :  { %378 = vsyncadd [#allocation3], 4294965248  ;;  %v384_v0 = vmov 0.0   ;;  %vm53_vm0 = vcmask 1043456   ;;  %vm385_vm1 = vmmov 1   ;;  %v34_v2 = vld [vmem:[#allocation2 + $0x8] sm:$0xff] }
  0x14   :  { %130 = vmatprep.mubr.f32.mxu0 %v384_v0  ;;  %201 = vmatprep.mubr.f32.mxu1 %v384_v0  ;;  %vm426_vm2 = vmpackc.low %vm53_vm0, %vm385_vm1  ;;  %v38_v3 = vld [vmem:[#allocation2 + $0x28] sm:$0xff]  ;;  %v33_v4 = vld [vmem:[#allocation2] sm:$0xff]  ;;  %vm49_vm3 = vcmask 228352   ;;  %v386_v28 = vmov 0   ;;  %v387_v29 = vmov 1   ;;  %vm218_vm4 = vcmask 7168  }
  0x15   :  { %v298_v5 = vpack.c.bf16 %v38_v3, %v34_v2  ;;  %v37_v6 = vld [vmem:[#allocation2 + $0x20] sm:$0xff]  ;;  %v36_v7 = vld [vmem:[#allocation2 + $0x18] sm:$0xff]  ;;  %v42_v11 = vld [vmem:[#allocation2 + $0x48] sm:$0xff]  ;;  %326 = vset.pattern.permute.xlu1 %v386_v28  ;;  %328 = vset.pattern.permute.xlu0 %v386_v28  ;;  %vm227_vm5 = vcmask 15360   ;;  %vm247_vm6 = vcmask 1040384   ;;  %vm256_vm7 = vcmask 9216  }
  0x16   :  { %v40_v8 = vld [vmem:[#allocation2 + $0x38] sm:$0xff]  ;;  %v300_v9 = vpack.c.bf16 %v37_v6, %v33_v4  ;;  %v46_v12 = vld [vmem:[#allocation2 + $0x68] sm:$0xf]  ;;  %v35_v13 = vld [vmem:[#allocation2 + $0x10] sm:$0xff] }
  0x17   :  { %v308_v10 = vpack.c.bf16 %v40_v8, %v36_v7  ;;  %299 = vmatprep.subr.bf16.mxu0 %v298_v5  ;;  %v302_v14 = vpack.c.bf16 %v46_v12, %v42_v11  ;;  %v39_v15 = vld [vmem:[#allocation2 + $0x30] sm:$0xff]  ;;  %v41_v16 = vld [vmem:[#allocation2 + $0x40] sm:$0xff]  ;;  %v44_v20 = vld [vmem:[#allocation2 + $0x58] sm:$0xff] }
  0x18   :  { %v45_v17 = vld [vmem:[#allocation2 + $0x60] sm:$0xf]  ;;  %301 = vmatpush1.bf16.msra.mxu0 %v300_v9  ;;  %v310_v18 = vpack.c.bf16 %v39_v15, %v35_v13  ;;  %v48_v21 = vld [vmem:[#allocation2 + $0x78] sm:$0xf]  ;;  %v43_v23 = vld [vmem:[#allocation2 + $0x50] sm:$0xff] }
  0x19   :  { %309 = vmatprep.subr.bf16.mxu1 %v308_v10  ;;  %v305_v19 = vpack.c.bf16 %v45_v17, %v41_v16  ;;  %304 = vmatprep.subr.msk.bf16.mxu0 %vm426_vm2, %v302_v14  ;;  %v312_v22 = vpack.c.bf16 %v48_v21, %v44_v20  ;;  %v47_v24 = vld [vmem:[#allocation2 + $0x70] sm:$0xf]  ;;  %v32_v26 = vld [vmem:[%s463_s1] sm:$0xff] }
  0x1a   :  { %311 = vmatpush1.bf16.msra.mxu1 %v310_v18  ;;  %v315_v25 = vpack.c.bf16 %v47_v24, %v43_v23  ;;  %v220_v27 = vld [vmem:[%s464_s2] sm:$0xff] }
  0x1b   :  { %314 = vmatprep.subr.msk.bf16.mxu1 %vm426_vm2, %v312_v22  ;;  %223 = vperm.xlu1 %326, %v220_v27   ;;  %v249_v40 = vld [vmem:[%s465_s3] sm:$0x3]  ;;  %s388_s3 = smov [#allocation5]  }
  0x1c   :  { %307 = vmatpush1.bf16.msk.msra.mxu0 %vm426_vm2, %v305_v19  ;;  %s283_s6 = sshll.u32 %s388_s3, 4  ;;  %s284_s6 = int_to_ptr.vmem [resolvable:$true] %s283_s6 }
  0x1d   :  { %s355_s7 = scalar_lea.vmem %s284_s6, 32  ;;  %p360_p9 = scmp.lt.s32.totalorder %s284_s6, %s284_s6 }
  0x1e   :  { %317 = vmatpush1.bf16.msk.msra.mxu1 %vm426_vm2, %v315_v25  ;;  %p356_p8 = scmp.ne.s32.totalorder %s284_s6, %s355_s7  ;;  %p361_p10 = scmp.lt.s32.totalorder %s355_s7, %s355_s7 }
  0x1f   :  { %294 = vmatmul.mubr.msk.f32.vlgmr.msra.gmra.mrb[0].mxu0 %vm49_vm3, %v32_v26  ;;  %327 = vset.pattern.permute.xlu1 %v387_v29 }
  0x20   :  { %236 = vperm.xlu1 %327, %v220_v27   ;;  %p362_p11 = por %p361_p10, %p360_p9 }
  0x21   :  { %297 = vmatmul.mubr.msk.f32.vlgmr.msra.gmra.mrb[0].mxu1 %vm49_vm3, %v32_v26 }
  0x22   :  { %p363_p12 = pnand %p362_p11, %p356_p8 }
  0x9a   :  { %v224_v41 = vpop.permute.xlu1 %223 }
  0x9f   :  { %v237_v43 = vpop.permute.xlu1 %236 }
  0xf2   :  { %v132_v30 = vpop.f32.mrb[0].mxu0 }
  0xf3   :  { %v208_v31 = vmax.f32 %v132_v30, 0.0  ;;  %v134_v32 = vpop.f32.mrb[1].mxu0 }
  0xf4   :  { %v209_v33 = vmax.f32 %v134_v32, 0.0  ;;  %v203_v34 = vpop.f32.mrb[0].mxu1 }
  0xf5   :  { %v210_v35 = vmax.f32 %v203_v34, 0.0  ;;  %v205_v36 = vpop.f32.mrb[1].mxu1 }
  0xf6   :  { %v211_v37 = vmax.f32 %v205_v36, 0.0  ;;  %v212_v38 = vadd.f32 %v209_v33, %v208_v31 }
  0xf8   :  { %213 = vadd.xlane.f32.xlu0 %v212_v38  ;;  %v215_v39 = vadd.f32 %v211_v37, %v210_v35 }
  0xfc   :  { %216 = vadd.xlane.f32.xlu0 %v215_v39 }
 0x112   :  { %252 = vperm.xlu0 %328, %v249_v40  }
 0x185   :  { %v214_v42 = vpop.xlane.xlu0 %213 }
 0x189   :  { %v217_v44 = vpop.xlane.xlu0 %216 }
 0x18a   :  { %v219_v45 = vsel %vm218_vm4, %v214_v42, %v217_v44 }
 0x18b   :  { %v226_v46 = vmul.f32 %v224_v41, %v219_v45  ;;  %v239_v47 = vmul.f32 %v237_v43, %v219_v45 }
 0x18d   :  { %v228_v48 = vsel %vm227_vm5, %v226_v46, 0.0  ;;  %v240_v49 = vsel %vm227_vm5, %v239_v47, 0.0 }
 0x18e   :  { %v229_v50 = vrot.slane %v228_v48, 4  ;;  %v241_v51 = vrot.slane %v240_v49, 4 }
 0x190   :  { %v230_v52 = vadd.f32 %v229_v50, %v228_v48  ;;  %v242_v53 = vadd.f32 %v241_v51, %v240_v49 }
 0x191   :  { %v253_v62 = vpop.permute.xlu0 %252 }
 0x192   :  { %v231_v54 = vrot.slane %v230_v52, 2  ;;  %v243_v55 = vrot.slane %v242_v53, 2 }
 0x194   :  { %v232_v56 = vadd.f32 %v231_v54, %v230_v52  ;;  %v244_v57 = vadd.f32 %v243_v55, %v242_v53 }
 0x196   :  { %v245_v58 = vrot.slane %v244_v57, 1  ;;  %v233_v59 = vrot.slane %v232_v56, 1 }
 0x198   :  { %v234_v60 = vadd.f32 %v233_v59, %v232_v56  ;;  %v246_v61 = vadd.f32 %v245_v58, %v244_v57 }
 0x19a   :  { %v248_v63 = vsel %vm247_vm6, %v234_v60, %v246_v61 }
 0x19b   :  { %v255_v0 = vadd.f32 %v253_v62, %v248_v63 }
 0x19d   :  { %v257_v1 = vsel %vm256_vm7, %v255_v0, -inf }
 0x19e   :  { %v258_v2 = vrot.slane %v257_v1, 4 }
 0x1a0   :  { %v259_v3 = vmax.f32 %v257_v1, %v258_v2 }
 0x1a2   :  { %v260_v4 = vrot.slane %v259_v3, 2 }
 0x1a4   :  { %v261_v5 = vmax.f32 %v259_v3, %v260_v4 }
 0x1a6   :  { %v262_v6 = vrot.slane %v261_v5, 1 }
 0x1a8   :  { %v263_v7 = vmax.f32 %v261_v5, %v262_v6 }
 0x1aa   :  { %v264_v8 = vsub.f32 %v255_v0, %v263_v7 }
 0x1ac   :  { %v265_v9 = vmul.f32 1.442695, %v264_v8 }
 0x1ae   :  { %329 = vpow2.f32 %v265_v9 }
 0x1b8   :  { %v330_v10 = vpop.eup %329 }
 0x1b9   :  { %v267_v11 = vsel %vm256_vm7, %v330_v10, 0.0 }
 0x1ba   :  { %v268_v12 = vrot.slane %v267_v11, 4 }
 0x1bc   :  { %v269_v13 = vadd.f32 %v268_v12, %v267_v11 }
 0x1be   :  { %v270_v14 = vrot.slane %v269_v13, 2 }
 0x1c0   :  { %v271_v15 = vadd.f32 %v270_v14, %v269_v13 }
 0x1c2   :  { %v272_v16 = vrot.slane %v271_v15, 1 }
 0x1c4   :  { %v273_v17 = vadd.f32 %v272_v16, %v271_v15 }
 0x1c6   :  { %331 = vrcp.f32 %v273_v17 }
 0x1d0   :  { %v332_v18 = vpop.eup %331 }
 0x1d1   :  { %v275_v19 = vmul.f32 %v332_v18, %v330_v10 }
 0x1d3   :  { %276 = vst.msk [vmem:[#allocation5] sm:$0x3] %vm256_vm7, %v275_v19 }
 0x1d4   :  { %366 = shalt.err (!%p363_p12)
}
 0x1d5   :  { %s367_s10 = scalar_lea.hbm %s466_s4, 32 }
 0x1d6   :  { %p368_p13 = scmp.ne.s32.totalorder %s466_s4, %s367_s10  ;;  %p371_p0 = scmp.lt.u32.totalorder %s367_s10, %s466_s4 }
 0x1d8   :  { %p373_p1 = pnand %p371_p0, %p368_p13 }
 0x1da   :  { %376 = shalt.err (!%p373_p1)
}
 0x1db   :  { %286 = dma.vmem_to_hbm [thread:$0]  %s284_s6, 32, %s466_s4, [#allocation4]  }
 0x1dc   :  { %379 = dma.done.wait [#allocation4], 32  }
 0x1dd   :  { %380 = vsyncadd [#allocation4], 4294967264 }
 0x1de   :  { %290 = vsyncpa [#allocation3], 1 }
 0x1df   :  { %291 = vsyncpa [#allocation4], 1 }

</bundles_post_ra>
